<compile_context>
chip_gen: v7x
topology: tpu7x:2x2x1
jax: 0.10.0
libtpu: 0.0.40
codegen_flags: <defaults>
</compile_context>

<pallas_src>
import jax
import jax.numpy as jnp
from jax.experimental import pallas as pl
from jax.experimental.pallas import tpu as pltpu


# ----------------------------- helpers -----------------------------------------------

def _round_up(x, m):
    return (x + m - 1) // m * m


def _vmem_budget_bytes():
    # v5e/v6e: 128 MiB physical -> ~102 MiB usable; v7x: 64 MiB -> ~51 MiB usable.
    try:
        cap = pltpu.get_tpu_info().vmem_capacity_bytes
    except Exception:
        cap = 64 << 20          # conservative (v7x per-TC) if the query is unavailable
    return int(cap * 0.8)       # headroom for Mosaic internal scratch / semaphores


def _choose_k_tile(dim, max_tile=1024, min_tile=256, min_steps=4):
    """128-aligned contraction tile; prefer >= min_steps grid steps so DMA overlaps MXU."""
    aligned = _round_up(dim, 128)
    tile = min(_round_up(max_tile, 128), aligned)
    while tile > min_tile and pl.cdiv(aligned, tile) < min_steps:
        tile = max(_round_up(tile // 2, 128), min_tile)
    return tile


def _divisor_tile(dim, pref):
    """Largest multiple of 128 dividing dim and <= pref (or the full dim if unaligned)."""
    if dim % 128 != 0:
        return dim
    t = min(_round_up(pref, 128), dim)
    t = (t // 128) * 128
    while dim % t != 0:
        t -= 128
    return max(t, 128)


def _batch_tile(B, pref=256):
    if B % 8 != 0 or B <= pref:
        return B
    t = (pref // 8) * 8
    while B % t != 0:
        t -= 8
    return t


# ----------------------------- stage 1: backbone Linear1 + ReLU ----------------------

def backbone_kernel(x_ref, w1_ref, b1_ref, rep_ref, acc_ref):
    k = pl.program_id(2)

    @pl.when(k == 0)
    def _():
        acc_ref[...] = jnp.zeros_like(acc_ref)

    # bf16 MXU operands, f32 accumulation
    acc_ref[...] += jnp.dot(x_ref[...], w1_ref[...],
                            preferred_element_type=jnp.float32)

    @pl.when(k == pl.num_programs(2) - 1)
    def _():
        # forward hook on the ReLU child: representation = flatten(ReLU(Linear1(x)))
        rep_ref[...] = jnp.maximum(acc_ref[...] + b1_ref[...], 0.0).astype(rep_ref.dtype)


def _backbone_call(x_bf, w1_bf, b1, *, tm, tn, tk, vmem_budget):
    B, in_dim_p = x_bf.shape
    feat = w1_bf.shape[1]
    nm, nn, nk = B // tm, feat // tn, in_dim_p // tk

    tile_bytes = (
        2 * (tm * tk * 2) + 2 * (tk * tn * 2)   # double-buffered x / w1 tiles (bf16)
        + 2 * (tn * 4)                          # b1 tile (f32)
        + 2 * (tm * tn * 2)                     # rep output tile (bf16)
        + tm * tn * 4                           # f32 accumulator scratch
    )
    vmem_limit = int(min(max(2 * tile_bytes, 16 << 20), vmem_budget))

    cost = pl.CostEstimate(
        flops=2 * B * in_dim_p * feat,
        transcendentals=0,
        bytes_accessed=x_bf.size * 2 + w1_bf.size * 2 + b1.size * 4 + B * feat * 2,
    )

    grid_spec = pltpu.PrefetchScalarGridSpec(
        num_scalar_prefetch=0,
        grid=(nm, nn, nk),
        in_specs=[
            pl.BlockSpec((tm, tk), lambda i, j, k: (i, k)),   # x  : streamed over K
            pl.BlockSpec((tk, tn), lambda i, j, k: (k, j)),   # w1 : streamed over K
            pl.BlockSpec((1, tn), lambda i, j, k: (0, j)),    # b1
        ],
        out_specs=pl.BlockSpec((tm, tn), lambda i, j, k: (i, j)),
        scratch_shapes=[pltpu.VMEM((tm, tn), jnp.float32)],
    )
    return pl.pallas_call(
        backbone_kernel,
        out_shape=jax.ShapeDtypeStruct((B, feat), jnp.bfloat16),
        grid_spec=grid_spec,
        compiler_params=pltpu.CompilerParams(
            dimension_semantics=("parallel", "parallel", "arbitrary"),
            vmem_limit_bytes=vmem_limit),
        cost_estimate=cost,
    )(x_bf, w1_bf, b1)


# ----------------------------- stage 2: projector MLP (Linear-BN-ReLU-Linear) --------

def projector_kernel(rep_ref, wp1_ref, bp1_ref, gamma_ref, beta_ref,
                     wp2_ref, bp2_ref, o_ref, acc_ref):
    k = pl.program_id(0)

    @pl.when(k == 0)
    def _():
        acc_ref[...] = jnp.zeros_like(acc_ref)

    # projector Linear-1, streamed over the feat contraction
    acc_ref[...] += jnp.dot(rep_ref[...], wp1_ref[...],
                            preferred_element_type=jnp.float32)

    @pl.when(k == pl.num_programs(0) - 1)
    def _():
        z = acc_ref[...] + bp1_ref[...]                       # (B, hid) f32
        # BatchNorm1d, training mode: biased batch statistics over the FULL batch
        # (batch axis intentionally not tiled across the grid).
        mean = jnp.mean(z, axis=0, keepdims=True)
        var = jnp.mean(z * z, axis=0, keepdims=True) - mean * mean
        var = jnp.maximum(var, 0.0)                           # guard f32 cancellation
        inv_std = jax.lax.rsqrt(var + 1e-5)                   # EUP rsqrt
        zn = (z - mean) * inv_std * gamma_ref[...] + beta_ref[...]
        a = jnp.maximum(zn, 0.0)

        out = jnp.dot(a.astype(jnp.bfloat16), wp2_ref[...],
                      preferred_element_type=jnp.float32) + bp2_ref[...]
        o_ref[...] = out.astype(o_ref.dtype)


def _projector_call(rep_bf, wp1_bf, bp1, gamma, beta, wp2_bf, bp2, *,
                    tkf, vmem_budget, single_buffer_residents):
    B, feat = rep_bf.shape
    hid = wp1_bf.shape[1]
    proj = wp2_bf.shape[1]
    nkf = feat // tkf

    resident_bufs = 1 if single_buffer_residents else 2
    tile_bytes = (
        2 * (B * tkf * 2) + 2 * (tkf * hid * 2)                     # streamed rep / wp1
        + resident_bufs * (hid * proj * 2 + (3 * hid + proj) * 4)   # resident operands
        + 2 * (B * proj * 4)                                        # output
        + B * hid * 4                                               # f32 accumulator
    )
    vmem_limit = int(min(max(2 * tile_bytes, 16 << 20), vmem_budget))

    def resident(shape):
        # Loop-invariant operands: index_map is constant over k, so Pallas does not
        # re-fetch them; Buffered(1) removes the useless second buffer.
        if single_buffer_residents:
            return pl.BlockSpec(shape, lambda k: (0, 0), pipeline_mode=pl.Buffered(1))
        return pl.BlockSpec(shape, lambda k: (0, 0))

    cost = pl.CostEstimate(
        flops=2 * B * (feat * hid + hid * proj),
        transcendentals=hid,
        bytes_accessed=(rep_bf.size * 2 + wp1_bf.size * 2 + wp2_bf.size * 2
                        + (bp1.size + gamma.size + beta.size + bp2.size) * 4
                        + B * proj * 4),
    )

    grid_spec = pltpu.PrefetchScalarGridSpec(
        num_scalar_prefetch=0,
        grid=(nkf,),
        in_specs=[
            pl.BlockSpec((B, tkf), lambda k: (0, k)),     # rep : streamed over feat
            pl.BlockSpec((tkf, hid), lambda k: (k, 0)),   # wp1 : streamed over feat
            resident((1, hid)),                           # bp1
            resident((1, hid)),                           # gamma
            resident((1, hid)),                           # beta
            resident((hid, proj)),                        # wp2
            resident((1, proj)),                          # bp2
        ],
        out_specs=pl.BlockSpec((B, proj), lambda k: (0, 0)),
        scratch_shapes=[pltpu.VMEM((B, hid), jnp.float32)],
    )
    return pl.pallas_call(
        projector_kernel,
        out_shape=jax.ShapeDtypeStruct((B, proj), jnp.float32),
        grid_spec=grid_spec,
        compiler_params=pltpu.CompilerParams(
            dimension_semantics=("arbitrary",),           # feat contraction is a reduction
            vmem_limit_bytes=vmem_limit),
        cost_estimate=cost,
    )(rep_bf, wp1_bf, bp1, gamma, beta, wp2_bf, bp2)


# ----------------------------- full forward -------------------------------------------

def netwrapper_forward(x_nchw, params):
    B = x_nchw.shape[0]
    x_flat = x_nchw.reshape(B, -1).astype(jnp.float32)    # same as torch flatten()
    in_dim = x_flat.shape[1]

    (w1, b1, wp1, bp1, gamma, beta, wp2, bp2) = params
    feat, hid, proj = w1.shape[1], wp1.shape[1], wp2.shape[1]

    vmem_budget = _vmem_budget_bytes()

    # --- stage 1: backbone Linear1 + ReLU (the hooked hidden == representation) ---
    tk = _choose_k_tile(in_dim)
    in_dim_p = _round_up(in_dim, tk)
    if in_dim_p != in_dim:                                  # zero-pad is exact for matmul
        x_flat = jnp.pad(x_flat, ((0, 0), (0, in_dim_p - in_dim)))
        w1 = jnp.pad(w1, ((0, in_dim_p - in_dim), (0, 0)))
    tm = _batch_tile(B)
    tn = _divisor_tile(feat, 512)

    rep = _backbone_call(
        x_flat.astype(jnp.bfloat16), w1.astype(jnp.bfloat16), b1,
        tm=tm, tn=tn, tk=tk, vmem_budget=vmem_budget)       # (B, feat) bf16

    # --- stage 2: projector MLP on the full batch (BN needs full-batch stats) ---
    tkf = _divisor_tile(feat, 512)
    wp1_bf = wp1.astype(jnp.bfloat16)
    wp2_bf = wp2.astype(jnp.bfloat16)
    try:
        out = _projector_call(rep, wp1_bf, bp1, gamma, beta, wp2_bf, bp2,
                              tkf=tkf, vmem_budget=vmem_budget,
                              single_buffer_residents=True)
    except Exception:
        # Fallback if this Pallas build rejects pipeline_mode=pl.Buffered(1).
        out = _projector_call(rep, wp1_bf, bp1, gamma, beta, wp2_bf, bp2,
                              tkf=tkf, vmem_budget=vmem_budget,
                              single_buffer_residents=False)
    return out


# ----------------------------- params / reference -------------------------------------

def init_params(key, in_dim, feat, hid, proj):
    ks = jax.random.split(key, 6)
    scale = lambda d: 1.0 / jnp.sqrt(jnp.float32(d))
    # weights stored pre-transposed from PyTorch's (out, in) to (in, out)
    w1 = jax.random.normal(ks[0], (in_dim, feat), jnp.float32) * scale(in_dim)
    b1 = jax.random.normal(ks[1], (1, feat), jnp.float32) * 0.01
    wp1 = jax.random.normal(ks[2], (feat, hid), jnp.float32) * scale(feat)
    bp1 = jax.random.normal(ks[3], (1, hid), jnp.float32) * 0.01
    gamma = jnp.ones((1, hid), jnp.float32)          # BatchNorm1d default init
    beta = jnp.zeros((1, hid), jnp.float32)
    wp2 = jax.random.normal(ks[4], (hid, proj), jnp.float32) * scale(hid)
    bp2 = jax.random.normal(ks[5], (1, proj), jnp.float32) * 0.01
    return (w1, b1, wp1, bp1, gamma, beta, wp2, bp2)


def reference_forward(x_nchw, params):
    """Pure-JAX reference with the same bf16-operand / f32-accumulate numerics."""
    x = x_nchw.reshape(x_nchw.shape[0], -1)
    w1, b1, wp1, bp1, gamma, beta, wp2, bp2 = params
    h = jnp.dot(x.astype(jnp.bfloat16), w1.astype(jnp.bfloat16),
                preferred_element_type=jnp.float32) + b1
    rep = jnp.maximum(h, 0.0).astype(jnp.bfloat16)
    z = jnp.dot(rep, wp1.astype(jnp.bfloat16),
                preferred_element_type=jnp.float32) + bp1
    mean = jnp.mean(z, axis=0, keepdims=True)
    var = jnp.maximum(jnp.mean(z * z, axis=0, keepdims=True) - mean * mean, 0.0)
    zn = (z - mean) * jax.lax.rsqrt(var + 1e-5) * gamma + beta
    a = jnp.maximum(zn, 0.0)
    return jnp.dot(a.astype(jnp.bfloat16), wp2.astype(jnp.bfloat16),
                   preferred_element_type=jnp.float32) + bp2


if __name__ == "__main__":
    # Small shapes consistent with the module: NCHW image input, layer=-2 hook.
    # Feature dims chosen lane-friendly (multiples of 128) per TPU layout rules.
    B, C, H, W = 2, 4, 16, 16
    in_dim = C * H * W                 # 1024 flattened backbone input
    feat = 128                         # backbone hidden dim -> representation dim
    projection_hidden_size = 128       # MLP hidden (stand-in for 4096)
    projection_size = 128

    key = jax.random.PRNGKey(0)
    kx, kp = jax.random.split(key)
    x = jax.random.normal(kx, (B, C, H, W), jnp.float32)
    params = init_params(kp, in_dim, feat, projection_hidden_size, projection_size)

    out = netwrapper_forward(x, params)
    jax.block_until_ready(out)

    ref = reference_forward(x, params)
    assert out.shape == (B, projection_size)
    assert jnp.all(jnp.isfinite(out))
    assert jnp.allclose(out, ref, rtol=2e-2, atol=2e-2), (
        float(jnp.max(jnp.abs(out - ref))))
    print("KERNEL_OK")
</pallas_src>

<mosaic_0001>
module attributes {stable_mosaic.version = 11 : i64} {
  func.func @backbone_kernel(%arg0: i32, %arg1: i32, %arg2: i32, %arg3: memref<2x256xbf16, #tpu.memory_space<vmem>>, %arg4: memref<256x128xbf16, #tpu.memory_space<vmem>>, %arg5: memref<1x128xf32, #tpu.memory_space<vmem>>, %arg6: memref<2x128xbf16, #tpu.memory_space<vmem>>, %arg7: memref<2x128xf32, #tpu.memory_space<vmem>>) attributes {dimension_semantics = [#tpu.dimension_semantics<parallel>, #tpu.dimension_semantics<parallel>, #tpu.dimension_semantics<arbitrary>], iteration_bounds = array<i64: 1, 1, 4>, scalar_prefetch = 0 : i64, scratch_operands = 1 : i64, tpu.core_type = #tpu.core_type<tc>, window_params = [{transform_indices = @transform_0, window_bounds = array<i64: 2, 256>}, {transform_indices = @transform_1, window_bounds = array<i64: 256, 128>}, {transform_indices = @transform_2, window_bounds = array<i64: 1, 128>}, {transform_indices = @transform_3, window_bounds = array<i64: 2, 128>}]} {
    %c0_i32 = arith.constant 0 : i32
    %0 = arith.cmpi eq, %arg2, %c0_i32 : i32
    %1 = arith.extui %0 : i1 to i32
    %c0_i32_0 = arith.constant 0 : i32
    %2 = arith.cmpi ne, %1, %c0_i32_0 : i32
    scf.if %2 {
      %cst_9 = arith.constant 0.000000e+00 : f32
      %12 = vector.broadcast %cst_9 : f32 to vector<2x128xf32>
      %c0_10 = arith.constant 0 : index
      %c0_11 = arith.constant 0 : index
      %13 = vector.load %arg7[%c0_10, %c0_11] : memref<2x128xf32, #tpu.memory_space<vmem>>, vector<2x128xf32>
      tpu.vector_store %arg7[%c0_10, %c0_11], %12 {strides = array<i32>} : memref<2x128xf32, #tpu.memory_space<vmem>>, vector<2x128xf32>,
    } else {
    }
    %c0 = arith.constant 0 : index
    %c0_1 = arith.constant 0 : index
    %3 = vector.load %arg7[%c0, %c0_1] : memref<2x128xf32, #tpu.memory_space<vmem>>, vector<2x128xf32>
    %c0_2 = arith.constant 0 : index
    %c0_3 = arith.constant 0 : index
    %4 = vector.load %arg3[%c0_2, %c0_3] : memref<2x256xbf16, #tpu.memory_space<vmem>>, vector<2x256xbf16>
    %c0_4 = arith.constant 0 : index
    %c0_5 = arith.constant 0 : index
    %5 = vector.load %arg4[%c0_4, %c0_5] : memref<256x128xbf16, #tpu.memory_space<vmem>>, vector<256x128xbf16>
    %cst = arith.constant dense<0.000000e+00> : vector<2x128xf32>
    %6 = tpu.matmul %4, %5, %cst {dimension_numbers = #tpu.dot_dimension_numbers<[1], [0], [0], [1], [0, 0, 1, 1], [], []>} : vector<2x256xbf16>, vector<256x128xbf16>, vector<2x128xf32> -> vector<2x128xf32>
    %7 = arith.addf %3, %6 : vector<2x128xf32>
    %c0_6 = arith.constant 0 : index
    %c0_7 = arith.constant 0 : index
    %8 = vector.load %arg7[%c0_6, %c0_7] : memref<2x128xf32, #tpu.memory_space<vmem>>, vector<2x128xf32>
    tpu.vector_store %arg7[%c0_6, %c0_7], %7 {strides = array<i32>} : memref<2x128xf32, #tpu.memory_space<vmem>>, vector<2x128xf32>,
    %c3_i32 = arith.constant 3 : i32
    %9 = arith.cmpi eq, %arg2, %c3_i32 : i32
    %10 = arith.extui %9 : i1 to i32
    %c0_i32_8 = arith.constant 0 : i32
    %11 = arith.cmpi ne, %10, %c0_i32_8 : i32
    scf.if %11 {
      %c0_9 = arith.constant 0 : index
      %c0_10 = arith.constant 0 : index
      %12 = vector.load %arg7[%c0_9, %c0_10] : memref<2x128xf32, #tpu.memory_space<vmem>>, vector<2x128xf32>
      %c0_11 = arith.constant 0 : index
      %c0_12 = arith.constant 0 : index
      %13 = vector.load %arg5[%c0_11, %c0_12] : memref<1x128xf32, #tpu.memory_space<vmem>>, vector<1x128xf32>
      %14 = vector.broadcast %13 : vector<1x128xf32> to vector<2x128xf32>
      %15 = arith.addf %12, %14 : vector<2x128xf32>
      %cst_13 = arith.constant 0.000000e+00 : f32
      %16 = vector.broadcast %cst_13 : f32 to vector<2x128xf32>
      %17 = arith.maximumf %15, %16 : vector<2x128xf32>
      %18 = arith.truncf %17 : vector<2x128xf32> to vector<2x128xbf16>
      %c0_14 = arith.constant 0 : index
      %c0_15 = arith.constant 0 : index
      %19 = vector.load %arg6[%c0_14, %c0_15] : memref<2x128xbf16, #tpu.memory_space<vmem>>, vector<2x128xbf16>
      tpu.vector_store %arg6[%c0_14, %c0_15], %18 {strides = array<i32>} : memref<2x128xbf16, #tpu.memory_space<vmem>>, vector<2x128xbf16>,
    } else {
    }
    return
  }
  func.func @transform_0(%arg0: i32, %arg1: i32, %arg2: i32) -> (i32, i32) {
    %c0_i32 = arith.constant 0 : i32
    return %arg0, %arg2 : i32, i32
  }
  func.func @transform_1(%arg0: i32, %arg1: i32, %arg2: i32) -> (i32, i32) {
    %c0_i32 = arith.constant 0 : i32
    return %arg2, %arg1 : i32, i32
  }
  func.func @transform_2(%arg0: i32, %arg1: i32, %arg2: i32) -> (i32, i32) {
    %c0_i32 = arith.constant 0 : i32
    %c0_i32_0 = arith.constant 0 : i32
    return %c0_i32, %arg1 : i32, i32
  }
  func.func @transform_3(%arg0: i32, %arg1: i32, %arg2: i32) -> (i32, i32) {
    %c0_i32 = arith.constant 0 : i32
    return %arg0, %arg1 : i32, i32
  }
}

</mosaic_0001>

<bundles_post_ra>
// kernel: tpu_custom_call.1
= control target key start
LH: loop header
LB: loop body
LE: loop exit
PB: predicated region body
PF: predicated region fallthrough
CT: control target
= control target key end

     0   :  { %8 = vsyncpa [#allocation4], 0  ;;  %s1144_s0 = inlined_call_operand.hbm [shape: bf16[2,1024], index: 0, kind: input, shape index: {}]   ;;  %s1145_s1 = inlined_call_operand.hbm [shape: bf16[1024,128], index: 1, kind: input, shape index: {}]   ;;  %s1146_s2 = inlined_call_operand.vmem [shape: f32[1,128], index: 2, kind: input, shape index: {}]   ;;  %s1147_s3 = inlined_call_operand.hbm [shape: bf16[2,128], index: 3, kind: output, shape index: {}]  }
   0x1   :  { %10 = vsyncpa [#allocation4 + $0x1], 0 }
   0x2   :  { %11 = vsyncpa [#allocation7], 0 }
   0x3   :  { %13 = vsyncpa [#allocation7 + $0x1], 0 }
   0x4   :  { %14 = vsyncpa [#allocation5], 0  ;;  %s919_s12 = smov 0   ;;  %s921_s13 = smov 0  }
   0x5   :  { %s923_s14 = smov 0   ;;  %s925_s15 = smov 0  }
   0x6   :  { %s927_s16 = smov 0   ;;  %s929_s17 = smov 0  }
   0x7 LB: > { %s598_s18 = sadd.s32 4294967295, %s890_s17   ;;  %s32_s19 = sadd.s32 1, %s886_s16  ;;  %s890_s17 = sphi %s929_s17, %s20_s17   ;;  %s886_s16 = sphi %s927_s16, %s1161_s16   ;;  %s882_s15 = sphi %s925_s15, %s1160_s15   ;;  %s878_s14 = sphi %s923_s14, %s1159_s14   ;;  %s874_s13 = sphi %s921_s13, %s1158_s13   ;;  %s870_s12 = sphi %s919_s12, %s1157_s12  }
   0x8   : > { %p33_p0 = scmp.ge.s32.totalorder %s32_s19, 4  ;;  %s48_s20 = sadd.s32 1, %s878_s14 }
   0x9   : > { %p55_p1 = scmp.ne.s32.totalorder %s878_s14, %s874_s13  ;;  %p56_p2 = scmp.eq.s32.totalorder %s890_s17, 0 }
   0xa   : > { %s1163_s19 = smov (%p33_p0, %s32_s19), 0  ;;  %p61_p4 = scmp.ne.s32.totalorder %s874_s13, %s870_s12 }
   0xb   : > { %p955_p3 = por %p56_p2, %p55_p1  ;;  %s44_s22 = ssub.s32 %s886_s16, %s1163_s19 }
   0xc   : > { %p62_p5 = scmp.eq.s32.totalorder %s598_s18, 0  ;;  %p46_p6 = scmp.eq.s32.totalorder %s44_s22, 0 }
   0xd   : > { %p674_p8 = scmp.lt.s32.totalorder %s890_s17, 4  ;;  %s973_s25 = sand.u32 1, %s878_s14  }
   0xe   : > { %p964_p7 = por %p62_p5, %p61_p4  ;;  %s635_s26 = sshll.u32 %s886_s16, 5 }
   0xf   : > { %s970_s24 = scalar_select %p46_p6, %s878_s14, %s48_s20  }
  0x10   : > { %s1150_s23 = scalar_select %p964_p7, 1, 0 }
  0x11   : > { %s602_s27 = sshll.u32 %s973_s25, 1  ;;  %s980_s30 = scalar_lea.hbm %s1144_s0, %s635_s26 }
  0x12   : > { %s177_s4 = scalar_lea.vmem [#allocation3], %s602_s27  ;;  %p984_p9 = pnand %p674_p8, %p955_p3 }
  0x13   : > { %s187_s5 = sshll.u32 %s177_s4, 4  ;;  %s174_s7 = scalar_lea.sflag [#allocation4], %s973_s25  ;;  %s988_s5 = int_to_ptr.vmem [resolvable:$true] %s187_s5 }
  0x14   : > { %s746_s8 = scalar_lea.hbm %s980_s30, 32  ;;  %p748_p13 = pneg %p984_p9 }
  0x15   : > { %p747_p12 = scmp.ne.s32.totalorder %s980_s30, %s746_s8  ;;  %s751_s11 = scalar_lea.hbm %s1144_s0, 128 }
  0x16   : > { %p752_p2 = scmp.lt.u32.totalorder %s980_s30, %s1144_s0  ;;  %p753_p3 = scmp.lt.u32.totalorder %s751_s11, %s746_s8 }
  0x17   : > { %p749_p0 = pnand %p748_p13, %p747_p12  ;;  %p755_p5 = scmp.lt.u32.totalorder %s746_s8, %s980_s30 }
  0x18   : > { %p754_p4 = por %p753_p3, %p752_p2 }
  0x19   : > { %p750_p1 = pneg %p749_p0 }
  0x1a   : > { %p756_p6 = por %p755_p5, %p754_p4 }
  0x1c   : > { %p757_p8 = pnand %p756_p6, %p750_p1 }
  0x1e   : > { %760 = shalt.err (!%p757_p8)
}
  0x1f   : > { %s761_s21 = scalar_lea.vmem %s988_s5, 32  ;;  %s892_s22 = smov [#allocation3]  }
  0x20   : > { %p762_p12 = scmp.ne.s32.totalorder %s988_s5, %s761_s21  ;;  %s766_s26 = sshll.u32 %s892_s22, 4  ;;  %s767_s26 = int_to_ptr.vmem [resolvable:$false] %s766_s26 }
  0x21   : > { %s768_s27 = scalar_lea.vmem %s767_s26, 64  ;;  %p769_p11 = scmp.lt.s32.totalorder %s988_s5, %s767_s26 }
  0x22   : > { %p764_p0 = pnand %p762_p12, %p748_p13  ;;  %p770_p2 = scmp.lt.s32.totalorder %s768_s27, %s761_s21 }
  0x24   : > { %p765_p10 = pneg %p764_p0  ;;  %p771_p3 = por %p770_p2, %p769_p11 }
  0x26   : > { %p772_p4 = pnand %p771_p3, %p765_p10 }
  0x28   : > { %775 = shalt.err (!%p772_p4)
}
  0x29   : > { %670 = dma.hbm_to_vmem [thread:$0]  (!%p984_p9), %s980_s30, 32, %s988_s5, %s174_s7  }
  0x2a   : > { %p1152_p1 = scmp.lt.s32.totalorder %s890_s17, 5  ;;  %p1153_p5 = scmp.ge.s32.totalorder %s890_s17, 1 }
  0x2b   : > { %s605_s29 = sshll.u32 %s973_s25, 7  ;;  %s636_s4 = sshll.u32 %s886_s16, 11 }
  0x2c   : > { %p1022_p6 = pnand %p1153_p5, %p1152_p1  ;;  %s1031_s10 = scalar_lea.hbm %s1145_s1, %s636_s4 }
  0x2d   : > { %s198_s11 = scalar_lea.vmem [#allocation6], %s605_s29  ;;  %s195_s30 = scalar_lea.sflag [#allocation7], %s973_s25 }
  0x2e   : > { %s206_s12 = sshll.u32 %s198_s11, 4  ;;  %s776_s5 = scalar_lea.hbm %s1031_s10, 2048  ;;  %s1033_s12 = int_to_ptr.vmem [resolvable:$true] %s206_s12 }
  0x2f   : > { %p777_p10 = scmp.ne.s32.totalorder %s1031_s10, %s776_s5  ;;  %s781_s21 = scalar_lea.hbm %s1145_s1, 8192 }
  0x30   : > { %p782_p12 = scmp.lt.u32.totalorder %s1031_s10, %s1145_s1  ;;  %p783_p0 = scmp.lt.u32.totalorder %s781_s21, %s776_s5 }
  0x31   : > { %p779_p11 = pnand %p777_p10, %p748_p13  ;;  %p785_p3 = scmp.lt.u32.totalorder %s776_s5, %s1031_s10 }
  0x32   : > { %p784_p2 = por %p783_p0, %p782_p12 }
  0x33   : > { %p780_p8 = pneg %p779_p11 }
  0x34   : > { %p786_p4 = por %p785_p3, %p784_p2 }
  0x36   : > { %p787_p1 = pnand %p786_p4, %p780_p8 }
  0x38   : > { %790 = shalt.err (!%p787_p1)
}
  0x39   : > { %s791_s27 = scalar_lea.vmem %s1033_s12, 2048  ;;  %s893_s29 = smov [#allocation6]  }
  0x3a   : > { %p792_p5 = scmp.ne.s32.totalorder %s1033_s12, %s791_s27  ;;  %s796_s4 = sshll.u32 %s893_s29, 4  ;;  %s797_s4 = int_to_ptr.vmem [resolvable:$false] %s796_s4 }
  0x3b   : > { %s798_s8 = scalar_lea.vmem %s797_s4, 4096  ;;  %p799_p7 = scmp.lt.s32.totalorder %s1033_s12, %s797_s4 }
  0x3c   : > { %p794_p10 = pnand %p792_p5, %p748_p13  ;;  %p800_p12 = scmp.lt.s32.totalorder %s798_s8, %s791_s27 }
  0x3e   : > { %p795_p11 = pneg %p794_p10  ;;  %p801_p0 = por %p800_p12, %p799_p7 }
  0x40   : > { %p802_p2 = pnand %p801_p0, %p795_p11 }
  0x42   : > { %805 = shalt.err (!%p802_p2)
}
  0x43   : > { %s894_s9 = smov 64   ;;  %s895_s11 = smov 4  }
  0x44   : > { %673 = dma.hbm_to_vmem [thread:$0]  (!%p984_p9), %s1031_s10, 2048, %s1033_s12, %s195_s30, %s894_s9, %s894_s9, %s895_s11  }
  0x45   : > { %218 = sbr.rel (%p1022_p6) target bundleno = 379 (0x17b), region = 32  ;;  %s220_s5 = sand.u32 (!%p1022_p6), 1, %s874_s13  }
  0x46   : > { %s609_s7 = sshll.u32 (!%p1022_p6), %s220_s5, 1  ;;  %s221_s20 = scalar_lea.sflag (!%p1022_p6), [#allocation4], %s220_s5 }
  0x47   : > { %s1064_s21 = scalar_lea.vmem (!%p1022_p6), [#allocation3], %s609_s7  ;;  %p1155_p7 = scmp.ne.s32.totalorder (!%p1022_p6), %s1150_s23, 0 }
  0x4c   : > { %857 = dma.done.wait (%p1155_p7), %s221_s20, 32  }
  0x4d   : > { %859 = vsyncadd (%p1155_p7), %s221_s20, 4294967264  ;;  %s610_s22 = sshll.u32 %s220_s5, 7  ;;  %s230_s6 = scalar_lea.sflag [#allocation7], %s220_s5 }
  0x4e   : > { %s1070_s25 = scalar_lea.vmem [#allocation6], %s610_s22 }
  0x4f   : > { %861 = dma.done.wait (%p1155_p7), %s230_s6, 2048  }
  0x50   : > { %863 = vsyncadd (%p1155_p7), %s230_s6, 4294965248  ;;  %p611_p9 = scmp.ne.s32.totalorder %s882_s15, 0 }
  0x51   : > { %v896_v0 = vmov (!%p611_p9), 0.0  }
  0x52   : > { %268 = sbr.rel (%p611_p9) target bundleno = 89 (0x59), region = 44  ;;  %269 = vst [vmem:[#allocation2] sm:$0x3] (!%p611_p9), %v896_v0 }
  0x59 PF: > { %v730_v1 = vld [vmem:[%s1070_s25 + $0x40] sm:$0xff]   ;;  %v732_v3 = vld [vmem:[%s1070_s25 + $0x48] sm:$0xff]   ;;  %v734_v5 = vld [vmem:[%s1070_s25 + $0x50] sm:$0xff]   ;;  %v316_v10 = vlaneseq  ;;  %v897_v14 = vmov 1966171168   ;;  %p629_p13 = scmp.ne.s32.totalorder %s882_s15, 3 }
  0x5a   : > { %v731_v2 = vld [vmem:[%s1070_s25] sm:$0xff]   ;;  %637 = vmatprep.subr.bf16.mxu0 %v730_v1  ;;  %v733_v4 = vld [vmem:[%s1070_s25 + $0x8] sm:$0xff]   ;;  %v735_v6 = vld [vmem:[%s1070_s25 + $0x10] sm:$0xff]   ;;  %v314_v15 = vunpack.c.l.s4 %v897_v14 }
  0x5b   : > { %638 = vmatpush3.bf16.msra.mxu0 %v731_v2  ;;  %v736_v7 = vld [vmem:[%s1070_s25 + $0x58] sm:$0xff]   ;;  %v738_v9 = vld [vmem:[%s1070_s25 + $0x60] sm:$0xff]   ;;  %v740_v12 = vld [vmem:[%s1070_s25 + $0x68] sm:$0xff]   ;;  %v317_v16 = vshrl.u32 %v316_v10, 7 }
  0x5c   : > { %639 = vmatprep.subr.bf16.mxu0 %v732_v3  ;;  %v737_v8 = vld [vmem:[%s1070_s25 + $0x18] sm:$0xff]   ;;  %v739_v11 = vld [vmem:[%s1070_s25 + $0x20] sm:$0xff]   ;;  %v741_v17 = vld [vmem:[%s1070_s25 + $0x28] sm:$0xff]   ;;  %v315_v19 = vunpack.c.0.s8 %v314_v15 }
  0x5d   : > { %v612_v13 = vld.sshfl [vmem:[%s1064_s21] sm:$0x11 pattern:$0x75316420]  ;;  %v742_v20 = vld [vmem:[%s1070_s25 + $0x70] sm:$0xff]  }
  0x5e   : > { %v312_v18 = vcombine.high %v612_v13, %v612_v13  ;;  %v318_v21 = vsub.s32 %v315_v19, %v317_v16  ;;  %v743_v22 = vld [vmem:[%s1070_s25 + $0x30] sm:$0xff]   ;;  %v744_v24 = vld [vmem:[%s1070_s25 + $0x78] sm:$0xff]  }
  0x5f   : > { %640 = vmatpush3.bf16.msra.mxu0 %v733_v4  ;;  %v745_v25 = vld [vmem:[%s1070_s25 + $0x38] sm:$0xff]  }
  0x60   : > { %641 = vmatprep.subr.bf16.mxu0 %v734_v5  ;;  %v326_v23 = vrot.slane %v312_v18, %v318_v21  ;;  %v319_v26 = vrot.slane %v612_v13, %v318_v21  ;;  %v270_v28 = vld [vmem:[#allocation2] sm:$0x3] }
  0x61   : > { %v630_v35 = vld [vmem:[%s1146_s2] ss:$0 sm:$0xff] (!%p629_p13) }
  0x62   : > { %457 = vmatprep.mubr.bf16.mxu0 %v326_v23 }
  0x63   : > { %642 = vmatpush3.bf16.msra.mxu0 %v735_v6 }
  0x64   : > { %643 = vmatprep.subr.bf16.mxu0 %v736_v7 }
  0x67   : > { %644 = vmatpush3.bf16.msra.mxu0 %v737_v8 }
  0x68   : > { %645 = vmatprep.subr.bf16.mxu0 %v738_v9 }
  0x6b   : > { %646 = vmatpush3.bf16.msra.mxu0 %v739_v11 }
  0x6c   : > { %647 = vmatprep.subr.bf16.mxu0 %v740_v12 }
  0x6f   : > { %648 = vmatpush3.bf16.msra.mxu0 %v741_v17 }
  0x70   : > { %649 = vmatprep.subr.bf16.mxu0 %v742_v20 }
  0x73   : > { %650 = vmatpush3.bf16.msra.mxu0 %v743_v22 }
  0x74   : > { %651 = vmatprep.subr.bf16.mxu0 %v744_v24 }
  0x77   : > { %652 = vmatpush3.bf16.msra.mxu0 %v745_v25 }
  0x7a   : > { %458 = vmatmul.mubr.bf16.vlgmr.msra.gmra.mrb[0].mxu0 %v319_v26 }
 0x14d   : > { %v653_v27 = vpop.f32.mrb[0].mxu0  ;;  %470 = sbr.rel (%p629_p13) target bundleno = 354 (0x162), region = 48 }
 0x14e   : > { %v654_v29 = vpop.f32.mrb[1].mxu0 }
 0x14f   : > { %v655_v30 = vadd.f32 %v654_v29, %v653_v27  ;;  %v656_v31 = vpop.f32.mrb[2].mxu0 }
 0x150   : > { %v657_v32 = vpop.f32.mrb[3].mxu0 }
 0x151   : > { %v465_v33 = vadd.f32 %v655_v30, %v270_v28 }
 0x153   : > { %466 = vst [vmem:[#allocation2] sm:$0x3] %v465_v33 }
 0x15a   : > { %v471_v34 = vld [vmem:[#allocation2] sm:$0x3] }
 0x15b   : > { %v479_v36 = vadd.f32 %v630_v35, %v471_v34 }
 0x15d   : > { %v480_v37 = vmax.f32 %v479_v36, 0.0 }
 0x15f   : > { %v481_v38 = vpack.c.bf16 %v480_v37, %v480_v37 }
 0x161   : > { %482 = vst [vmem:[#allocation8] sm:$0x1] %v481_v38 }
 0x162 PF: > { %p1100_p6 = scmp.eq.s32.totalorder %s598_s18, 3  ;;  %s898_s12 = smov [#allocation8]  }
 0x163   : > { %s493_s15 = sshll.u32 %s898_s12, 4  ;;  %s494_s15 = int_to_ptr.vmem [resolvable:$true] %s493_s15 }
 0x164   : > { %s806_s30 = scalar_lea.vmem %s494_s15, 16  ;;  %s812_s26 = scalar_lea.vmem %s494_s15, 32 }
 0x165   : > { %p807_p8 = scmp.ne.s32.totalorder %s494_s15, %s806_s30  ;;  %p813_p1 = scmp.lt.s32.totalorder %s494_s15, %s494_s15 }
 0x166   : > { %p814_p5 = scmp.lt.s32.totalorder %s812_s26, %s806_s30 }
 0x167   : > { %p808_p3 = pnand %p807_p8, %p1100_p6 }
 0x168   : > { %p815_p10 = por %p814_p5, %p813_p1 }
 0x169   : > { %p809_p4 = pneg %p808_p3 }
 0x16b   : > { %p816_p11 = pnand %p815_p10, %p809_p4 }
 0x16d   : > { %819 = shalt.err (!%p816_p11)
}
 0x16e   : > { %s820_s29 = scalar_lea.hbm %s1147_s3, 16 }
 0x16f   : > { %p821_p12 = scmp.ne.s32.totalorder %s1147_s3, %s820_s29  ;;  %p826_p7 = scmp.lt.u32.totalorder %s820_s29, %s1147_s3 }
 0x171   : > { %p822_p0 = pnand %p821_p12, %p1100_p6 }
 0x173   : > { %p823_p2 = pneg %p822_p0 }
 0x175   : > { %p828_p9 = pnand %p826_p7, %p823_p2 }
 0x177   : > { %831 = shalt.err (!%p828_p9)
}
 0x178   : > { %664 = dma.vmem_to_hbm [thread:$0]  (%p1100_p6), %s494_s15, 16, %s1147_s3, [#allocation5]  }
 0x179   : > { %865 = dma.done.wait (%p1100_p6), [#allocation5], 16  }
 0x17a   : > { %867 = vsyncadd (%p1100_p6), [#allocation5], 4294967280 }
 0x17b PF: > { %s20_s17 = sadd.s32 1, %s890_s17   ;;  %s1157_s12 = smov %s874_s13 }
 0x17c   : > { %p17_p13 = scmp.ge.s32.totalorder %s20_s17, 6   ;;  %s1158_s13 = smov %s878_s14 }
 0x17d   : > { %s1159_s14 = smov %s970_s24  ;;  %s1160_s15 = smov %s886_s16 }
 0x17e   : > { %s1161_s16 = smov %s1163_s19  ;;  %19 = sbr.rel (!%p17_p13) target bundleno = 7 (0x7), region = 94 }
 0x185   :  { %506 = vsyncpa [#allocation4], 1 }
 0x186   :  { %508 = vsyncpa [#allocation4 + $0x1], 1 }
 0x187   :  { %509 = vsyncpa [#allocation7], 1 }
 0x188   :  { %511 = vsyncpa [#allocation7 + $0x1], 1 }
 0x189   :  { %512 = vsyncpa [#allocation5], 1 }
 0x18a   :  { %514 = vsyncpa [#allocation5 + $0x1], 1 }

</bundles_post_ra>
